<compile_context>
chip_gen: v6e
topology: v6e:2x2x1
jax: 0.10.0
libtpu: 0.0.40
codegen_flags: <defaults>
</compile_context>

<pallas_src>
import numpy as np

import jax
import jax.numpy as jnp
from jax.experimental import pallas as pl
from jax.experimental.pallas import tpu as pltpu

# ----------------------------- model dims -----------------------------------
C_IN = 4          # image channels (small synthetic stand-in for RGB)
HIDDEN = 32       # 1x1-conv output channels
NUM_CLASSES = 16  # stand-in for ResNet-50's 1000 classes
H = W = 16        # spatial
B = 2             # batch
N_MASKS = 5       # number of masks in `masks` (dim=1)


# ----------------------------- Pallas kernel --------------------------------
def fused_mask_classify_kernel(img_ref, masks_ref, w1t_ref, b1_ref, w2_ref,
                               b2_ref, out_ref):
    """One batch row per grid step; ALL masks of that row handled in the step.

    img_ref  : (1, C, HW)     channels on sublanes, HW=256 on lanes (lane-dense)
    masks_ref: (1, M, HW)     all masks for this batch row
    w1t_ref  : (HIDDEN, C)    1x1-conv weights, pre-transposed
    b1_ref   : (HIDDEN, 1)    1x1-conv bias (column)
    w2_ref   : (HIDDEN, NC)   FC head weights
    b2_ref   : (1, NC)        FC head bias
    out_ref  : (1, M, NC)     softmax probabilities for every mask
    """
    img = img_ref[0]                      # (C, HW)
    masks = masks_ref[0]                  # (M, HW)

    # Hoisted 1x1 conv (mask-independent, computed ONCE per image):
    # (HIDDEN, C) @ (C, HW) -> (HIDDEN, HW); HW stays on lanes.
    z = jnp.dot(w1t_ref[...], img, preferred_element_type=jnp.float32)

    # Per-mask scale, bias AFTER the scale (so the hoist is exact), ReLU.
    # All M masks at once: (M, 1, HW) * (1, HIDDEN, HW) -> (M, HIDDEN, HW).
    h = jnp.maximum(
        masks[:, None, :] * z[None, :, :] + b1_ref[...][None, :, :], 0.0)

    # Global average pool over HW (single lane reduce) -> (M, HIDDEN).
    inv_hw = 1.0 / float(h.shape[-1])
    pooled = jnp.sum(h, axis=-1) * inv_hw

    # Batched FC head for all M masks in one matmul: (M, HIDDEN) @ (HIDDEN, NC).
    logits = jnp.dot(pooled, w2_ref[...],
                     preferred_element_type=jnp.float32) + b2_ref[...]

    # Softmax over the class dim (matches torch .softmax(dim=1)); EUP approx
    # reciprocal sits in its own VLIW slot.
    mx = jnp.max(logits, axis=-1, keepdims=True)
    e = jnp.exp(logits - mx)
    probs = e * pl.reciprocal(jnp.sum(e, axis=-1, keepdims=True), approx=True)
    out_ref[0, :, :] = probs


# ------------------------------ device wrapper -------------------------------
@jax.jit
def _forward_device(img_nchw, masks_nmhw, w1, b1, w2, b2):
    """Returns (preds_all (B, M, NC), keep (M,) bool). One kernel launch."""
    bsz, c, h, w = img_nchw.shape
    m_cnt = masks_nmhw.shape[1]
    hw = h * w
    hidden = w1.shape[1]
    nc = w2.shape[1]

    # Layout prep (tiny, fused by XLA). NCHW already has HW contiguous last.
    img_flat = img_nchw.reshape(bsz, c, hw)        # (B, C, HW)
    masks_flat = masks_nmhw.reshape(bsz, m_cnt, hw)  # (B, M, HW)
    w1t = w1.T                                     # (HIDDEN, C)
    b1c = b1.reshape(hidden, 1)                    # (HIDDEN, 1)

    preds_all = pl.pallas_call(
        fused_mask_classify_kernel,
        out_shape=jax.ShapeDtypeStruct((bsz, m_cnt, nc), jnp.float32),
        grid=(bsz,),
        in_specs=[
            pl.BlockSpec((1, c, hw), lambda i: (i, 0, 0)),
            pl.BlockSpec((1, m_cnt, hw), lambda i: (i, 0, 0)),
            pl.BlockSpec((hidden, c), lambda i: (0, 0)),
            pl.BlockSpec((hidden, 1), lambda i: (0, 0)),
            pl.BlockSpec((hidden, nc), lambda i: (0, 0)),
            pl.BlockSpec((1, nc), lambda i: (0, 0)),
        ],
        out_specs=pl.BlockSpec((1, m_cnt, nc), lambda i: (i, 0, 0)),
        compiler_params=pltpu.CompilerParams(
            dimension_semantics=("parallel",)),  # batch rows -> both v7x TCs
    )(img_flat, masks_flat, w1t, b1c, w2, b2)

    # Device-side threshold: one reduction, no per-mask host round-trips.
    mask_sums = jnp.sum(masks_flat, axis=(0, 2))      # (M,)
    keep = mask_sums > 0.1 * jnp.sum(mask_sums)       # (M,) bool
    return preds_all, keep


# --------------------------- module-level glue -------------------------------
def init_params(key):
    k1, k2, k3, k4 = jax.random.split(key, 4)
    w1 = jax.random.normal(k1, (C_IN, HIDDEN), jnp.float32) * 0.1
    b1 = jax.random.normal(k2, (1, HIDDEN), jnp.float32) * 0.01
    w2 = jax.random.normal(k3, (HIDDEN, NUM_CLASSES), jnp.float32) * 0.1
    b2 = jax.random.normal(k4, (1, NUM_CLASSES), jnp.float32) * 0.01
    return w1, b1, w2, b2


def mask_classifier_forward(img_nchw, masks_nmhw, params):
    """Mirrors MaskClassifier.forward.

    img_nchw : (B, C, H, W) float32
    masks    : (B, M, H, W) float32
    returns  : (B, K, NUM_CLASSES) for the K masks with m.sum() > masks.sum()*0.1
    """
    w1, b1, w2, b2 = params
    preds_all, keep = _forward_device(img_nchw, masks_nmhw, w1, b1, w2, b2)
    keep_np = np.asarray(keep)                       # single device->host sync
    if not keep_np.any():
        # Same failure mode as torch.cat of an empty list in the reference.
        raise ValueError("No mask passed the 10% threshold.")
    idx = np.flatnonzero(keep_np)
    return preds_all[:, idx, :]                      # (B, K, NC), gather on device


def reference_forward(img_nchw, masks_nmhw, params):
    """Pure-JAX reference of the same stand-in classifier, for verification."""
    w1, b1, w2, b2 = params
    bsz = img_nchw.shape[0]
    s = float(jnp.sum(masks_nmhw))
    preds = []
    for k in range(masks_nmhw.shape[1]):
        m = masks_nmhw[:, k:k + 1]                               # (B,1,H,W)
        if float(jnp.sum(m)) > s * 0.1:
            x = img_nchw * m                                     # broadcast over C
            x = jnp.transpose(x, (0, 2, 3, 1)).reshape(bsz, -1, C_IN)
            h = jnp.maximum(jnp.einsum('bpc,ch->bph', x, w1) + b1, 0.0)
            pooled = jnp.mean(h, axis=1)                         # (B, HIDDEN)
            logits = pooled @ w2 + b2
            p = jax.nn.softmax(logits, axis=1)
            preds.append(p.reshape(bsz, 1, -1))
    return jnp.concatenate(preds, axis=1)


if __name__ == "__main__":
    key = jax.random.PRNGKey(0)
    k_img, k_mask, k_param = jax.random.split(key, 3)

    img = jax.random.normal(k_img, (B, C_IN, H, W), jnp.float32)

    # Masks with varying density so the 10%-of-total threshold actually filters.
    keep_prob = jnp.array([0.9, 0.5, 0.5, 0.02, 0.5], jnp.float32)  # mask 3 dropped
    u = jax.random.uniform(k_mask, (B, N_MASKS, H, W))
    masks = (u < keep_prob[None, :, None, None]).astype(jnp.float32)

    params = init_params(k_param)

    out = mask_classifier_forward(img, masks, params)
    out = jax.block_until_ready(out)

    ref = reference_forward(img, masks, params)
    # approx reciprocal in the softmax -> allow ~1e-3 deviation from exact softmax
    np.testing.assert_allclose(np.asarray(out), np.asarray(ref), rtol=1e-3, atol=1e-3)
    assert out.shape[0] == B and out.shape[2] == NUM_CLASSES
    # each row is a softmax -> sums to ~1
    np.testing.assert_allclose(np.asarray(out).sum(-1), 1.0, rtol=1e-3, atol=1e-3)

    print("KERNEL_OK")
</pallas_src>

<mosaic_0001>
module attributes {stable_mosaic.version = 11 : i64} {
  func.func @fused_mask_classify_kernel(%arg0: i32, %arg1: memref<1x4x256xf32, #tpu.memory_space<vmem>>, %arg2: memref<1x5x256xf32, #tpu.memory_space<vmem>>, %arg3: memref<32x4xf32, #tpu.memory_space<vmem>>, %arg4: memref<32x1xf32, #tpu.memory_space<vmem>>, %arg5: memref<32x16xf32, #tpu.memory_space<vmem>>, %arg6: memref<1x16xf32, #tpu.memory_space<vmem>>, %arg7: memref<1x5x16xf32, #tpu.memory_space<vmem>>) attributes {dimension_semantics = [#tpu.dimension_semantics<parallel>], iteration_bounds = array<i64: 2>, scalar_prefetch = 0 : i64, scratch_operands = 0 : i64, tpu.core_type = #tpu.core_type<tc>, window_params = [{transform_indices = @transform_0, window_bounds = array<i64: 1, 4, 256>}, {transform_indices = @transform_1, window_bounds = array<i64: 1, 5, 256>}, {pipeline_mode = #tpu.pipeline_mode<synchronous>, transform_indices = @transform_2, window_bounds = array<i64: 32, 4>}, {pipeline_mode = #tpu.pipeline_mode<synchronous>, transform_indices = @transform_3, window_bounds = array<i64: 32, 1>}, {pipeline_mode = #tpu.pipeline_mode<synchronous>, transform_indices = @transform_4, window_bounds = array<i64: 32, 16>}, {pipeline_mode = #tpu.pipeline_mode<synchronous>, transform_indices = @transform_5, window_bounds = array<i64: 1, 16>}, {transform_indices = @transform_6, window_bounds = array<i64: 1, 5, 16>}]} {
    %c0 = arith.constant 0 : index
    %c0_0 = arith.constant 0 : index
    %c0_1 = arith.constant 0 : index
    %0 = vector.load %arg1[%c0, %c0_0, %c0_1] : memref<1x4x256xf32, #tpu.memory_space<vmem>>, vector<1x4x256xf32>
    %1 = vector.shape_cast %0 : vector<1x4x256xf32> to vector<4x256xf32>
    %c0_2 = arith.constant 0 : index
    %c0_3 = arith.constant 0 : index
    %c0_4 = arith.constant 0 : index
    %2 = vector.load %arg2[%c0_2, %c0_3, %c0_4] : memref<1x5x256xf32, #tpu.memory_space<vmem>>, vector<1x5x256xf32>
    %3 = vector.shape_cast %2 : vector<1x5x256xf32> to vector<5x256xf32>
    %c0_5 = arith.constant 0 : index
    %c0_6 = arith.constant 0 : index
    %4 = vector.load %arg3[%c0_5, %c0_6] : memref<32x4xf32, #tpu.memory_space<vmem>>, vector<32x4xf32>
    %cst = arith.constant dense<0.000000e+00> : vector<32x256xf32>
    %5 = tpu.matmul %4, %1, %cst {dimension_numbers = #tpu.dot_dimension_numbers<[1], [0], [0], [1], [0, 0, 1, 1], [], []>} : vector<32x4xf32>, vector<4x256xf32>, vector<32x256xf32> -> vector<32x256xf32>
    %6 = vector.shape_cast %3 : vector<5x256xf32> to vector<5x1x256xf32>
    %7 = vector.shape_cast %5 : vector<32x256xf32> to vector<1x32x256xf32>
    %8 = vector.broadcast %6 : vector<5x1x256xf32> to vector<5x32x256xf32>
    %9 = vector.broadcast %7 : vector<1x32x256xf32> to vector<5x32x256xf32>
    %10 = arith.mulf %8, %9 : vector<5x32x256xf32>
    %c0_7 = arith.constant 0 : index
    %c0_8 = arith.constant 0 : index
    %11 = vector.load %arg4[%c0_7, %c0_8] : memref<32x1xf32, #tpu.memory_space<vmem>>, vector<32x1xf32>
    %12 = vector.shape_cast %11 : vector<32x1xf32> to vector<1x32x1xf32>
    %13 = vector.broadcast %12 : vector<1x32x1xf32> to vector<5x32x256xf32>
    %14 = arith.addf %10, %13 : vector<5x32x256xf32>
    %cst_9 = arith.constant 0.000000e+00 : f32
    %15 = vector.broadcast %cst_9 : f32 to vector<5x32x256xf32>
    %16 = arith.maximumf %14, %15 : vector<5x32x256xf32>
    %cst_10 = arith.constant dense<0.000000e+00> : vector<5x32xf32>
    %17 = vector.multi_reduction <add>, %16, %cst_10 [2] : vector<5x32x256xf32> to vector<5x32xf32>
    %cst_11 = arith.constant 3.906250e-03 : f32
    %18 = vector.broadcast %cst_11 : f32 to vector<5x32xf32>
    %19 = arith.mulf %17, %18 : vector<5x32xf32>
    %c0_12 = arith.constant 0 : index
    %c0_13 = arith.constant 0 : index
    %20 = vector.load %arg5[%c0_12, %c0_13] : memref<32x16xf32, #tpu.memory_space<vmem>>, vector<32x16xf32>
    %cst_14 = arith.constant dense<0.000000e+00> : vector<5x16xf32>
    %21 = tpu.matmul %19, %20, %cst_14 {dimension_numbers = #tpu.dot_dimension_numbers<[1], [0], [0], [1], [0, 0, 1, 1], [], []>} : vector<5x32xf32>, vector<32x16xf32>, vector<5x16xf32> -> vector<5x16xf32>
    %c0_15 = arith.constant 0 : index
    %c0_16 = arith.constant 0 : index
    %22 = vector.load %arg6[%c0_15, %c0_16] : memref<1x16xf32, #tpu.memory_space<vmem>>, vector<1x16xf32>
    %23 = vector.broadcast %22 : vector<1x16xf32> to vector<5x16xf32>
    %24 = arith.addf %21, %23 : vector<5x16xf32>
    %cst_17 = arith.constant dense<0xFF800000> : vector<5xf32>
    %25 = vector.multi_reduction <maximumf>, %24, %cst_17 [1] : vector<5x16xf32> to vector<5xf32>
    %26 = vector.shape_cast %25 : vector<5xf32> to vector<5x1xf32>
    %27 = vector.broadcast %26 : vector<5x1xf32> to vector<5x16xf32>
    %28 = arith.subf %24, %27 : vector<5x16xf32>
    %29 = math.exp %28 : vector<5x16xf32>
    %cst_18 = arith.constant dense<0.000000e+00> : vector<5xf32>
    %30 = vector.multi_reduction <add>, %29, %cst_18 [1] : vector<5x16xf32> to vector<5xf32>
    %31 = vector.shape_cast %30 : vector<5xf32> to vector<5x1xf32>
    %32 = tpu.reciprocal %31 {approx = true} : vector<5x1xf32> -> vector<5x1xf32>
    %33 = vector.broadcast %32 : vector<5x1xf32> to vector<5x16xf32>
    %34 = arith.mulf %29, %33 : vector<5x16xf32>
    %c0_19 = arith.constant 0 : index
    %c0_20 = arith.constant 0 : index
    %c0_21 = arith.constant 0 : index
    %35 = vector.load %arg7[%c0_19, %c0_20, %c0_21] : memref<1x5x16xf32, #tpu.memory_space<vmem>>, vector<1x5x16xf32>
    %36 = vector.shape_cast %35 : vector<1x5x16xf32> to vector<5x16xf32>
    %37 = vector.shape_cast %34 : vector<5x16xf32> to vector<1x5x16xf32>
    tpu.vector_store %arg7[%c0_19, %c0_20, %c0_21], %37 {strides = array<i32>} : memref<1x5x16xf32, #tpu.memory_space<vmem>>, vector<1x5x16xf32>,
    return
  }
  func.func @transform_0(%arg0: i32) -> (i32, i32, i32) {
    %c0_i32 = arith.constant 0 : i32
    %c0_i32_0 = arith.constant 0 : i32
    %c0_i32_1 = arith.constant 0 : i32
    return %arg0, %c0_i32, %c0_i32_0 : i32, i32, i32
  }
  func.func @transform_1(%arg0: i32) -> (i32, i32, i32) {
    %c0_i32 = arith.constant 0 : i32
    %c0_i32_0 = arith.constant 0 : i32
    %c0_i32_1 = arith.constant 0 : i32
    return %arg0, %c0_i32, %c0_i32_0 : i32, i32, i32
  }
  func.func @transform_2(%arg0: i32) -> (i32, i32) {
    %c0_i32 = arith.constant 0 : i32
    %c0_i32_0 = arith.constant 0 : i32
    %c0_i32_1 = arith.constant 0 : i32
    return %c0_i32, %c0_i32_0 : i32, i32
  }
  func.func @transform_3(%arg0: i32) -> (i32, i32) {
    %c0_i32 = arith.constant 0 : i32
    %c0_i32_0 = arith.constant 0 : i32
    %c0_i32_1 = arith.constant 0 : i32
    return %c0_i32, %c0_i32_0 : i32, i32
  }
  func.func @transform_4(%arg0: i32) -> (i32, i32) {
    %c0_i32 = arith.constant 0 : i32
    %c0_i32_0 = arith.constant 0 : i32
    %c0_i32_1 = arith.constant 0 : i32
    return %c0_i32, %c0_i32_0 : i32, i32
  }
  func.func @transform_5(%arg0: i32) -> (i32, i32) {
    %c0_i32 = arith.constant 0 : i32
    %c0_i32_0 = arith.constant 0 : i32
    %c0_i32_1 = arith.constant 0 : i32
    return %c0_i32, %c0_i32_0 : i32, i32
  }
  func.func @transform_6(%arg0: i32) -> (i32, i32, i32) {
    %c0_i32 = arith.constant 0 : i32
    %c0_i32_0 = arith.constant 0 : i32
    %c0_i32_1 = arith.constant 0 : i32
    return %arg0, %c0_i32, %c0_i32_0 : i32, i32, i32
  }
}

</mosaic_0001>

<bundles_post_ra>
// kernel: _forward_device.1
= control target key start
LH: loop header
LB: loop body
LE: loop exit
PB: predicated region body
PF: predicated region fallthrough
CT: control target
= control target key end

     0   :  { %s1102_s21 = smov 0   ;;  %s1355_s0 = inlined_call_operand.vmem [shape: f32[2,4,256], index: 0, kind: input, shape index: {}]   ;;  %s1356_s1 = inlined_call_operand.vmem [shape: f32[2,5,256], index: 1, kind: input, shape index: {}]   ;;  %s1357_s2 = inlined_call_operand.vmem [shape: f32[32,4], index: 2, kind: input, shape index: {}]   ;;  %s1358_s3 = inlined_call_operand.vmem [shape: f32[32,1], index: 3, kind: input, shape index: {}]   ;;  %s1359_s4 = inlined_call_operand.vmem [shape: f32[32,16], index: 4, kind: input, shape index: {}]   ;;  %s1360_s5 = inlined_call_operand.vmem [shape: f32[1,16], index: 5, kind: input, shape index: {}]   ;;  %s1361_s6 = inlined_call_operand.vmem [shape: f32[2,5,16], index: 6, kind: output, shape index: {}]  }
   0x1 LB: > { %s995_s22 = sadd.s32 4294967295, %s1061_s21   ;;  %p999_p0 = scmp.ge.s32.totalorder %s1061_s21, 1  ;;  %s1061_s21 = sphi %s1102_s21, %s16_s21  }
   0x2   : > { %p222_p1 = scmp.lt.s32.totalorder %s1061_s21, 3 }
   0x4   : > { %p223_p2 = pnand %p999_p0, %p222_p1 }
   0x5   : > { %p256_p3 = scmp.lt.s32.totalorder (!%p223_p2), %s995_s22, 1 }
   0x6   : > { %226 = sbr.rel (%p223_p2) target bundleno = 915 (0x393), region = 44 }
   0xb   : > { %v1063_v0 = vmov 0.0   ;;  %s1363_s22 = smov (!%p256_p3, %s995_s22), 1  ;;  %v1064_v1 = vmov 0   ;;  %v518_v2 = vld [vmem:[%s1358_s3] sm:$0xff]  ;;  %v520_v3 = vld [vmem:[%s1358_s3 + $0x10] sm:$0xff]  ;;  %v519_v4 = vld [vmem:[%s1358_s3 + $0x8] sm:$0xff]  ;;  %v393_v14 = vlaneseq }
   0xc   : > { %361 = vmatprep.mubr.f32.mxu0 %v1063_v0  ;;  %1022 = vmatprep.subr.mxu1 %v1063_v0  ;;  %s1015_s27 = sshll.u32 %s1363_s22, 3  ;;  %s1016_s28 = sshll.u32 %s1363_s22, 4  ;;  %v521_v5 = vld [vmem:[%s1358_s3 + $0x18] sm:$0xff]  ;;  %vm292_vm0 = vcmask 1043456   ;;  %v273_v8 = vld [vmem:[%s1357_s2] sm:$0xff]  ;;  %vm279_vm1 = vcmask 31744  }
   0xd   : > { %1045 = vset.pattern.permute.xlu0 %v1064_v1  ;;  %1046 = vset.pattern.permute.xlu1 %v1064_v1  ;;  %s260_s11 = scalar_lea.vmem %s1355_s0, %s1015_s27  ;;  %s265_s14 = scalar_lea.vmem %s1356_s1, %s1016_s28  ;;  %v274_v9 = vld [vmem:[%s1357_s2 + $0x8] sm:$0xff]  ;;  %v275_v10 = vld [vmem:[%s1357_s2 + $0x10] sm:$0xff]  ;;  %v276_v11 = vld [vmem:[%s1357_s2 + $0x18] sm:$0xff]  ;;  %v1065_v12 = vmov 1966171168   ;;  %v1152_v16 = vshrl.u32 %v393_v14, 7 }
   0xe   : > { %524 = vperm.xlu0 %1045, %v518_v2   ;;  %534 = vperm.xlu1 %1046, %v520_v3   ;;  %v270_v6 = vld [vmem:[%s260_s11] sm:$0xff]  ;;  %v391_v13 = vunpack.c.l.s4 %v1065_v12  ;;  %vm1066_vm2 = vmmov 0   ;;  %vm744_vm3 = vcmask 130112   ;;  %vm751_vm4 = vcmask 195712  }
   0xf   : > { %v278_v7 = vcombine.high %v270_v6, %v270_v6  ;;  %v1048_v17 = vld [vmem:[%s265_s14] ss:$8 sps:$4 sm:$0xff]   ;;  %v1050_v21 = vld [vmem:[%s265_s14 + $0x4] ss:$8 sps:$4 sm:$0x11]   ;;  %v430_v26 = vsub.s32 0, %v1152_v16  ;;  %1030 = vmatprep.mubr.msk.f32.mxu1 %vm1066_vm2, %v1063_v0  ;;  %s269_s14 = scalar_lea.vmem %s1361_s6, %s1015_s27 }
  0x10   : > { %v392_v15 = vunpack.c.0.s8 %v391_v13  ;;  %v434_v27 = vsub.s32 1, %v1152_v16  ;;  %vm758_vm5 = vcmask 261312   ;;  %vm836_vm6 = vcmask 1041409  }
  0x11   : > { %1005 = vmatprep.subr.msk.mxu0 %vm292_vm0, %v278_v7  ;;  %vm838_vm7 = vcmask 1042434   ;;  %vm840_vm8 = vcmask 1043459   ;;  %vm842_vm9 = vcmask 1044484   ;;  %vm844_vm10 = vcmask 261120  }
  0x12   : > { %529 = vperm.xlu0 %1045, %v519_v4   ;;  %539 = vperm.xlu1 %1046, %v521_v5   ;;  %v395_v18 = vsub.s32 %v392_v15, %v1152_v16  ;;  %vm917_vm11 = vcmask 126976  }
  0x13   : > { %1006 = vmatpush1.msk.msra.mxu0 %vm292_vm0, %v270_v6 }
  0x14   : > { %1007 = vmatmul.mubr.msk.f32.vlgmr.msra.gmra.mxu0 %vm279_vm1, %v273_v8  ;;  %v396_v19 = vrot.slane %v1048_v17, %v395_v18  ;;  %v403_v24 = vrot.slane %v1050_v21, %v395_v18 }
  0x15   : > { %367 = vmatprep.mubr.f32.mxu0 %v1063_v0 }
  0x16   : > { %v404_v20 = vcombine.high %v396_v19, %v396_v19  ;;  %v411_v22 = vrot.slane %v396_v19, %v395_v18  ;;  %v418_v29 = vrot.slane %v403_v24, %v395_v18 }
  0x18   : > { %1008 = vmatmul.mubr.msk.f32.gmra.mxu0 %vm279_vm1, %v274_v9  ;;  %v425_v23 = vrot.slane %v404_v20, %v395_v18  ;;  %v426_v25 = vcombine.high %v411_v22, %v411_v22  ;;  %v1159_v31 = vrot.slane %v411_v22, %v430_v26  ;;  %v1165_v34 = vrot.slane %v411_v22, %v434_v27 }
  0x19   : > { %373 = vmatprep.mubr.f32.mxu0 %v1063_v0  ;;  %v1176_v43 = vrot.slane %v418_v29, %v430_v26  ;;  %v1185_v53 = vrot.slane %v418_v29, %v434_v27 }
  0x1a   : > { %v427_v28 = vcombine.high %v425_v23, %v425_v23  ;;  %v1157_v30 = vrot.slane %v426_v25, %v430_v26  ;;  %v1161_v32 = vrot.slane %v425_v23, %v430_v26  ;;  %v1163_v33 = vrot.slane %v426_v25, %v434_v27 }
  0x1b   : > { %v1167_v36 = vrot.slane %v425_v23, %v434_v27 }
  0x1c   : > { %1009 = vmatmul.mubr.msk.f32.gmra.mxu0 %vm279_vm1, %v275_v10  ;;  %v1169_v37 = vrot.slane %v427_v28, %v430_v26  ;;  %v1171_v38 = vrot.slane %v427_v28, %v434_v27 }
  0x1d   : > { %379 = vmatprep.mubr.f32.mxu0 %v1063_v0 }
  0x20   : > { %1010 = vmatmul.mubr.msk.f32.gmra.mxu0 %vm279_vm1, %v276_v11 }
  0x89   : > { %v525_v39 = vpop.permute.xlu0 %524 }
  0x8d   : > { %v1192_v63 = vpop.permute.xlu0 %529 }
  0xd4   : > { %v363_v35 = vpop.f32.mrf.mxu0 }
  0xd5   : > { %v494_v40 = vmul.f32 %v1157_v30, %v363_v35  ;;  %v478_v41 = vmul.f32 %v1159_v31, %v363_v35  ;;  %v486_v42 = vmul.f32 %v1161_v32, %v363_v35  ;;  %v502_v51 = vmul.f32 %v1169_v37, %v363_v35 }
  0xd6   : > { %v365_v44 = vpop.f32.mrf.mxu0  ;;  %v510_v57 = vmul.f32 %v1176_v43, %v363_v35 }
  0xd7   : > { %v495_v45 = vmul.f32 %v1163_v33, %v365_v44  ;;  %v558_v46 = vadd.f32 %v525_v39, %v494_v40  ;;  %v479_v47 = vmul.f32 %v1165_v34, %v365_v44  ;;  %v542_v48 = vadd.f32 %v525_v39, %v478_v41 }
  0xd8   : > { %v1180_v49 = vpop.f32.mrf.mxu0  ;;  %v487_v50 = vmul.f32 %v1167_v36, %v365_v44  ;;  %v503_v52 = vmul.f32 %v1171_v38, %v365_v44  ;;  %v550_v56 = vadd.f32 %v525_v39, %v486_v42  ;;  %v566_v8 = vadd.f32 %v525_v39, %v502_v51 }
  0xd9   : > { %v559_v54 = vadd.f32 %v525_v39, %v495_v45  ;;  %v543_v55 = vadd.f32 %v525_v39, %v479_v47  ;;  %v598_v59 = vmax.f32 %v558_v46, 0.0  ;;  %v480_v61 = vmul.f32 %v1159_v31, %v1180_v49 }
  0xda   : > { %v1188_v58 = vpop.f32.mrf.mxu0  ;;  %v551_v60 = vadd.f32 %v525_v39, %v487_v50  ;;  %v567_v62 = vadd.f32 %v525_v39, %v503_v52  ;;  %v582_v2 = vmax.f32 %v542_v48, 0.0  ;;  %v504_v9 = vmul.f32 %v1169_v37, %v1180_v49 }
  0xdb   : > { %v599_v1 = vmax.f32 %v559_v54, 0.0  ;;  %v583_v3 = vmax.f32 %v543_v55, 0.0  ;;  %v481_v4 = vmul.f32 %v1165_v34, %v1188_v58  ;;  %v544_v6 = vadd.f32 %v1192_v63, %v480_v61 }
  0xdc   : > { %v591_v5 = vmax.f32 %v551_v60, 0.0  ;;  %v1197_v7 = vpop.f32.mrf.mxu0  ;;  %v505_v13 = vmul.f32 %v1171_v38, %v1188_v58  ;;  %v590_v15 = vmax.f32 %v550_v56, 0.0  ;;  %v607_v19 = vmax.f32 %v567_v62, 0.0 }
  0xdd   : > { %v646_v10 = vadd.f32 %v599_v1, %v598_v59  ;;  %v622_v11 = vadd.f32 %v583_v3, %v582_v2  ;;  %v545_v12 = vadd.f32 %v1192_v63, %v481_v4  ;;  %v584_v17 = vmax.f32 %v544_v6, 0.0 }
  0xde   : > { %v1204_v18 = vpop.f32.mrf.mxu0  ;;  %v568_v20 = vadd.f32 %v1192_v63, %v504_v9  ;;  %v569_v22 = vadd.f32 %v1192_v63, %v505_v13  ;;  %v511_v23 = vmul.f32 %v1185_v53, %v365_v44  ;;  %v574_v24 = vadd.f32 %v525_v39, %v510_v57  ;;  %v1224_v57 = vpop.permute.xlu1 %534 }
  0xdf   : > { %647 = vadd.xlane.f32.xlu1 %v646_v10  ;;  %623 = vadd.xlane.f32.xlu0 %v622_v11  ;;  %v585_v21 = vmax.f32 %v545_v12, 0.0  ;;  %v606_v25 = vmax.f32 %v566_v8, 0.0  ;;  %v512_v26 = vmul.f32 %v1176_v43, %v1180_v49  ;;  %v513_v27 = vmul.f32 %v1185_v53, %v1188_v58 }
  0xe0   : > { %v1213_v28 = vpop.f32.mrf.mxu0  ;;  %v488_v29 = vmul.f32 %v1161_v32, %v1180_v49  ;;  %v634_v35 = vadd.f32 %v591_v5, %v590_v15  ;;  %v609_v41 = vmax.f32 %v569_v22, 0.0  ;;  %v575_v42 = vadd.f32 %v525_v39, %v511_v23 }
  0xe1   : > { %v625_v40 = vadd.f32 %v585_v21, %v584_v17  ;;  %v608_v45 = vmax.f32 %v568_v20, 0.0  ;;  %v576_v44 = vadd.f32 %v1192_v63, %v512_v26  ;;  %v577_v46 = vadd.f32 %v1192_v63, %v513_v27 }
  0xe2   : > { %v1219_v47 = vpop.f32.mrf.mxu0  ;;  %v489_v48 = vmul.f32 %v1167_v36, %v1188_v58  ;;  %v658_v50 = vadd.f32 %v607_v19, %v606_v25  ;;  %v614_v51 = vmax.f32 %v574_v24, 0.0  ;;  %v615_v52 = vmax.f32 %v575_v42, 0.0  ;;  %v540_v25 = vpop.permute.xlu1 %539 }
  0xe3   : > { %635 = vadd.xlane.f32.xlu0 %v634_v35  ;;  %626 = vadd.xlane.f32.xlu1 %v625_v40  ;;  %v661_v54 = vadd.f32 %v609_v41, %v608_v45  ;;  %v616_v55 = vmax.f32 %v576_v44, 0.0  ;;  %v617_v56 = vmax.f32 %v577_v46, 0.0  ;;  %v552_v39 = vadd.f32 %v1192_v63, %v488_v29 }
  0xe4   : > { %v670_v59 = vadd.f32 %v615_v52, %v614_v51  ;;  %v485_v60 = vmul.f32 %v1165_v34, %v1219_v47  ;;  %v493_v61 = vmul.f32 %v1167_v36, %v1219_v47  ;;  %v553_v62 = vadd.f32 %v1192_v63, %v489_v48 }
  0xe5   : > { %v673_v1 = vadd.f32 %v617_v56, %v616_v55  ;;  %v482_v2 = vmul.f32 %v1159_v31, %v1197_v7  ;;  %v483_v3 = vmul.f32 %v1165_v34, %v1204_v18  ;;  %v496_v4 = vmul.f32 %v1157_v30, %v1180_v49 }
  0xe6   : > { %v497_v5 = vmul.f32 %v1163_v33, %v1188_v58  ;;  %v498_v6 = vmul.f32 %v1157_v30, %v1197_v7  ;;  %v499_v8 = vmul.f32 %v1163_v33, %v1204_v18  ;;  %v593_v9 = vmax.f32 %v553_v62, 0.0 }
  0xe7   : > { %659 = vadd.xlane.f32.xlu0 %v658_v50  ;;  %662 = vadd.xlane.f32.xlu1 %v661_v54  ;;  %v546_v10 = vadd.f32 %v1224_v57, %v482_v2  ;;  %v547_v11 = vadd.f32 %v1224_v57, %v483_v3  ;;  %v490_v34 = vmul.f32 %v1161_v32, %v1197_v7  ;;  %v592_v15 = vmax.f32 %v552_v39, 0.0 }
  0xe8   : > { %v560_v49 = vadd.f32 %v1192_v63, %v496_v4  ;;  %v561_v12 = vadd.f32 %v1192_v63, %v497_v5  ;;  %v562_v58 = vadd.f32 %v1224_v57, %v498_v6  ;;  %v563_v13 = vadd.f32 %v1224_v57, %v499_v8 }
  0xe9   : > { %v586_v17 = vmax.f32 %v546_v10, 0.0  ;;  %v587_v19 = vmax.f32 %v547_v11, 0.0  ;;  %v491_v20 = vmul.f32 %v1167_v36, %v1204_v18  ;;  %v554_v24 = vadd.f32 %v1224_v57, %v490_v34 }
  0xea   : > { %v601_v21 = vmax.f32 %v561_v12, 0.0  ;;  %v602_v22 = vmax.f32 %v562_v58, 0.0  ;;  %v603_v23 = vmax.f32 %v563_v13, 0.0  ;;  %v506_v27 = vmul.f32 %v1169_v37, %v1197_v7 }
  0xeb   : > { %671 = vadd.xlane.f32.xlu0 %v670_v59  ;;  %674 = vadd.xlane.f32.xlu1 %v673_v1  ;;  %v628_v26 = vadd.f32 %v587_v19, %v586_v17  ;;  %v555_v63 = vadd.f32 %v1224_v57, %v491_v20  ;;  %v507_v29 = vmul.f32 %v1171_v38, %v1204_v18  ;;  %v600_v40 = vmax.f32 %v560_v49, 0.0 }
  0xec   : > { %v637_v35 = vadd.f32 %v593_v9, %v592_v15  ;;  %v492_v36 = vmul.f32 %v1161_v32, %v1213_v28  ;;  %v652_v41 = vadd.f32 %v603_v23, %v602_v22  ;;  %v594_v42 = vmax.f32 %v554_v24, 0.0  ;;  %v703_v23 = vld [vmem:[%s1359_s4 + $0x8] sm:$0xff]  ;;  %v702_v24 = vld [vmem:[%s1359_s4] sm:$0xff] }
  0xed   : > { %v570_v45 = vadd.f32 %v1224_v57, %v506_v27  ;;  %v571_v44 = vadd.f32 %v1224_v57, %v507_v29  ;;  %v595_v46 = vmax.f32 %v555_v63, 0.0  ;;  %v557_v50 = vadd.f32 %v540_v25, %v493_v61 }
  0xee   : > { %v556_v48 = vadd.f32 %v540_v25, %v492_v36  ;;  %v484_v51 = vmul.f32 %v1159_v31, %v1213_v28  ;;  %v501_v52 = vmul.f32 %v1163_v33, %v1219_v47  ;;  %v649_v54 = vadd.f32 %v601_v21, %v600_v40 }
  0xef   : > { %638 = vadd.xlane.f32.xlu0 %v637_v35  ;;  %629 = vadd.xlane.f32.xlu1 %v628_v26  ;;  %v549_v55 = vadd.f32 %v540_v25, %v485_v60  ;;  %v610_v32 = vmax.f32 %v570_v45, 0.0  ;;  %v611_v56 = vmax.f32 %v571_v44, 0.0  ;;  %v500_v59 = vmul.f32 %v1157_v30, %v1213_v28 }
  0xf0   : > { %v548_v39 = vadd.f32 %v540_v25, %v484_v51  ;;  %v514_v62 = vmul.f32 %v1176_v43, %v1197_v7  ;;  %v515_v61 = vmul.f32 %v1185_v53, %v1204_v18  ;;  %v509_v31 = vmul.f32 %v1171_v38, %v1219_v47 }
  0xf1   : > { %v640_v33 = vadd.f32 %v595_v46, %v594_v42  ;;  %v596_v1 = vmax.f32 %v556_v48, 0.0  ;;  %v597_v60 = vmax.f32 %v557_v50, 0.0  ;;  %v589_v3 = vmax.f32 %v549_v55, 0.0 }
  0xf2   : > { %v588_v2 = vmax.f32 %v548_v39, 0.0  ;;  %v564_v4 = vadd.f32 %v540_v25, %v500_v59  ;;  %v565_v5 = vadd.f32 %v540_v25, %v501_v52  ;;  %v664_v6 = vadd.f32 %v611_v56, %v610_v32 }
  0xf3   : > { %650 = vadd.xlane.f32.xlu0 %v649_v54  ;;  %653 = vadd.xlane.f32.xlu1 %v652_v41  ;;  %v578_v30 = vadd.f32 %v1224_v57, %v514_v62  ;;  %v579_v7 = vadd.f32 %v1224_v57, %v515_v61  ;;  %v508_v18 = vmul.f32 %v1169_v37, %v1213_v28  ;;  %v734_v46 = vand.u32 127, %v393_v14 }
  0xf4   : > { %v517_v38 = vmul.f32 %v1185_v53, %v1219_v47  ;;  %v643_v8 = vadd.f32 %v597_v60, %v596_v1  ;;  %v631_v9 = vadd.f32 %v589_v3, %v588_v2  ;;  %v604_v10 = vmax.f32 %v564_v4, 0.0 }
  0xf5   : > { %v605_v11 = vmax.f32 %v565_v5, 0.0  ;;  %v573_v34 = vadd.f32 %v540_v25, %v509_v31  ;;  %v618_v49 = vmax.f32 %v578_v30, 0.0  ;;  %v619_v12 = vmax.f32 %v579_v7, 0.0 }
  0xf6   : > { %v572_v58 = vadd.f32 %v540_v25, %v508_v18  ;;  %v516_v13 = vmul.f32 %v1176_v43, %v1213_v28  ;;  %v581_v37 = vadd.f32 %v540_v25, %v517_v38  ;;  %v705_v43 = vld [vmem:[%s1359_s4 + $0x18] sm:$0xff]  ;;  %v704_v28 = vld [vmem:[%s1359_s4 + $0x10] sm:$0xff]  ;;  %v739_v48 = vadd.s32 4294967288, %v734_v46 }
  0xf7   : > { %641 = vadd.xlane.f32.xlu0 %v640_v33  ;;  %665 = vadd.xlane.f32.xlu1 %v664_v6  ;;  %v613_v57 = vmax.f32 %v573_v34, 0.0  ;;  %v655_v15 = vadd.f32 %v605_v11, %v604_v10  ;;  %v676_v17 = vadd.f32 %v619_v12, %v618_v49  ;;  %v746_v52 = vadd.s32 4294967280, %v734_v46 }
  0xf8   : > { %v612_v53 = vmax.f32 %v572_v58, 0.0  ;;  %v580_v47 = vadd.f32 %v540_v25, %v516_v13  ;;  %v621_v21 = vmax.f32 %v581_v37, 0.0  ;;  %1023 = vmatpush3.msra.mxu1 %v705_v43  ;;  %v1301_v54 = vsub.s32 %v734_v46, %v1152_v16 }
  0xf9   : > { %1024 = vmatprep.subr.mxu1 %v1063_v0  ;;  %v1304_v56 = vsub.s32 %v739_v48, %v1152_v16  ;;  %v1307_v14 = vsub.s32 %v746_v52, %v1152_v16 }
  0xfa   : > { %v667_v19 = vadd.f32 %v613_v57, %v612_v53  ;;  %v620_v20 = vmax.f32 %v580_v47, 0.0  ;;  %1025 = vmatpush3.msra.mxu1 %v704_v28 }
  0xfb   : > { %644 = vadd.xlane.f32.xlu0 %v643_v8  ;;  %632 = vadd.xlane.f32.xlu1 %v631_v9 }
  0xfc   : > { %v679_v22 = vadd.f32 %v621_v21, %v620_v20  ;;  %1026 = vmatprep.subr.mxu1 %v1063_v0 }
  0xfd   : > { %1027 = vmatpush3.msra.mxu1 %v703_v23 }
  0xfe   : > { %1028 = vmatprep.subr.mxu1 %v1063_v0  ;;  %v753_v0 = vadd.s32 4294967272, %v734_v46 }
  0xff   : > { %656 = vadd.xlane.f32.xlu0 %v655_v15  ;;  %677 = vadd.xlane.f32.xlu1 %v676_v17 }
 0x100   : > { %1029 = vmatpush3.msra.mxu1 %v702_v24  ;;  %v756_v60 = vsub.s32 %v753_v0, %v1152_v16 }
 0x103   : > { %668 = vadd.xlane.f32.xlu0 %v667_v19 }
 0x107   : > { %680 = vadd.xlane.f32.xlu0 %v679_v22 }
 0x168   : > { %v648_v25 = vpop.xlane.xlu1 %647  ;;  %v624_v26 = vpop.xlane.xlu0 %623 }
 0x169   : > { %v690_v55 = vmul.f32 0.00390625, %v648_v25  ;;  %v682_v32 = vmul.f32 0.00390625, %v624_v26 }
 0x16b   : > { %v782_v2 = vrot.slane %v690_v55, %v1301_v54  ;;  %v738_v6 = vrot.slane %v682_v32, %v1301_v54 }
 0x16c   : > { %v636_v63 = vpop.xlane.xlu0 %635  ;;  %v627_v27 = vpop.xlane.xlu1 %626 }
 0x16d   : > { %v683_v62 = vmul.f32 0.00390625, %v627_v27  ;;  %v686_v3 = vmul.f32 0.00390625, %v636_v63 }
 0x16f   : > { %v743_v8 = vrot.slane %v683_v62, %v1304_v56  ;;  %v763_v13 = vrot.slane %v686_v3, %v1301_v54 }
 0x170   : > { %v660_v29 = vpop.xlane.xlu0 %659  ;;  %v663_v35 = vpop.xlane.xlu1 %662 }
 0x171   : > { %v694_v31 = vmul.f32 0.00390625, %v660_v29  ;;  %v695_v33 = vmul.f32 0.00390625, %v663_v35  ;;  %v745_v23 = vsel %vm744_vm3, %v743_v8, %v738_v6 }
 0x173   : > { %v801_v16 = vrot.slane %v694_v31, %v1301_v54  ;;  %v805_v49 = vrot.slane %v695_v33, %v1304_v56 }
 0x174   : > { %v672_v40 = vpop.xlane.xlu0 %671  ;;  %v675_v36 = vpop.xlane.xlu1 %674 }
 0x175   : > { %v698_v12 = vmul.f32 0.00390625, %v672_v40  ;;  %v699_v57 = vmul.f32 0.00390625, %v675_v36  ;;  %v806_v24 = vsel %vm744_vm3, %v805_v49, %v801_v16 }
 0x177   : > { %v820_v25 = vrot.slane %v698_v12, %v1301_v54  ;;  %v824_v63 = vrot.slane %v699_v57, %v1304_v56 }
 0x178   : > { %v639_v41 = vpop.xlane.xlu0 %638  ;;  %v630_v42 = vpop.xlane.xlu1 %629 }
 0x179   : > { %v687_v1 = vmul.f32 0.00390625, %v639_v41  ;;  %v684_v4 = vmul.f32 0.00390625, %v630_v42 }
 0x17b   : > { %v767_v58 = vrot.slane %v687_v1, %v1304_v56  ;;  %v750_v37 = vrot.slane %v684_v4, %v1307_v14 }
 0x17c   : > { %v651_v45 = vpop.xlane.xlu0 %650  ;;  %v654_v44 = vpop.xlane.xlu1 %653 }
 0x17d   : > { %v691_v61 = vmul.f32 0.00390625, %v651_v45  ;;  %v692_v30 = vmul.f32 0.00390625, %v654_v44  ;;  %v768_v26 = vsel %vm744_vm3, %v767_v58, %v763_v13  ;;  %v752_v27 = vsel %vm751_vm4, %v750_v37, %v745_v23 }
 0x17f   : > { %v786_v9 = vrot.slane %v691_v61, %v1304_v56  ;;  %v791_v17 = vrot.slane %v692_v30, %v1307_v14 }
 0x180   : > { %v642_v50 = vpop.xlane.xlu0 %641  ;;  %v666_v51 = vpop.xlane.xlu1 %665 }
 0x181   : > { %v688_v5 = vmul.f32 0.00390625, %v642_v50  ;;  %v696_v10 = vmul.f32 0.00390625, %v666_v51  ;;  %v787_v21 = vsel %vm744_vm3, %v786_v9, %v782_v2  ;;  %v825_v51 = vsel %vm744_vm3, %v824_v63, %v820_v25 }
 0x182   : > { %v792_v40 = vsel %vm751_vm4, %v791_v17, %v787_v21 }
 0x183   : > { %v772_v15 = vrot.slane %v688_v5, %v1307_v14  ;;  %v810_v22 = vrot.slane %v696_v10, %v1307_v14 }
 0x184   : > { %v645_v39 = vpop.xlane.xlu0 %644  ;;  %v633_v59 = vpop.xlane.xlu1 %632 }
 0x185   : > { %v689_v7 = vmul.f32 0.00390625, %v645_v39  ;;  %v685_v18 = vmul.f32 0.00390625, %v633_v59  ;;  %v773_v29 = vsel %vm751_vm4, %v772_v15, %v768_v26  ;;  %v811_v44 = vsel %vm751_vm4, %v810_v22, %v806_v24  ;;  %v1011_v59 = vld [vmem:[%s1360_s5] ss:$0 sm:$0xff] }
 0x187   : > { %v777_v53 = vrot.slane %v689_v7, %v756_v60  ;;  %v757_v47 = vrot.slane %v685_v18, %v756_v60 }
 0x188   : > { %v657_v38 = vpop.xlane.xlu0 %656  ;;  %v678_v34 = vpop.xlane.xlu1 %677 }
 0x189   : > { %v693_v11 = vmul.f32 0.00390625, %v657_v38  ;;  %v700_v19 = vmul.f32 0.00390625, %v678_v34  ;;  %v778_v36 = vsel %vm758_vm5, %v777_v53, %v773_v29  ;;  %v759_v41 = vsel %vm758_vm5, %v757_v47, %v752_v27 }
 0x18a   : > { %v837_v52 = vsel %vm836_vm6, %v778_v36, %v759_v41 }
 0x18b   : > { %v796_v43 = vrot.slane %v693_v11, %v756_v60  ;;  %v829_v42 = vrot.slane %v700_v19, %v1307_v14 }
 0x18c   : > { %v669_v20 = vpop.xlane.xlu0 %668 }
 0x18d   : > { %v697_v28 = vmul.f32 0.00390625, %v669_v20  ;;  %v797_v46 = vsel %vm758_vm5, %v796_v43, %v792_v40  ;;  %v830_v54 = vsel %vm751_vm4, %v829_v42, %v825_v51 }
 0x18e   : > { %v839_v55 = vsel %vm838_vm7, %v797_v46, %v837_v52 }
 0x18f   : > { %v815_v35 = vrot.slane %v697_v28, %v756_v60 }
 0x190   : > { %v681_v45 = vpop.xlane.xlu0 %680 }
 0x191   : > { %v701_v48 = vmul.f32 0.00390625, %v681_v45  ;;  %v816_v50 = vsel %vm758_vm5, %v815_v35, %v811_v44 }
 0x192   : > { %v841_v56 = vsel %vm840_vm8, %v816_v50, %v839_v55 }
 0x193   : > { %v834_v0 = vrot.slane %v701_v48, %v756_v60 }
 0x195   : > { %v835_v32 = vsel %vm758_vm5, %v834_v0, %v830_v54 }
 0x196   : > { %v843_v39 = vsel %vm842_vm9, %v835_v32, %v841_v56 }
 0x197   : > { %1031 = vmatmul.mubr.msk.f32.vlgmr.msra.gmra.mxu1 %vm844_vm10, %v843_v39 }
 0x257   : > { %v913_v62 = vpop.f32.mrf.mxu1 }
 0x258   : > { %v914_v14 = vadd.f32 %v1011_v59, %v913_v62 }
 0x259   : > { %v1032_v61 = vpop.f32.mrf.mxu1 }
 0x25a   : > { %v918_v31 = vsel %vm917_vm11, %v914_v14, -inf }
 0x25b   : > { %919 = vmax.xlane.f32.xlu1 %v918_v31 }
 0x2e4   : > { %v920_v33 = vpop.xlane.xlu1 %919 }
 0x2e5   : > { %v921_v1 = vsub.f32 %v914_v14, %v920_v33 }
 0x2e7   : > { %v922_v60 = vmul.f32 1.442695, %v921_v1 }
 0x2e9   : > { %1051 = vpow2.f32 %v922_v60 }
 0x2f6   : > { %v1052_v2 = vpop.eup %1051 }
 0x2f7   : > { %v924_v3 = vsel %vm917_vm11, %v1052_v2, 0.0 }
 0x2f8   : > { %925 = vadd.xlane.f32.xlu0 %v924_v3 }
 0x381   : > { %v926_v4 = vpop.xlane.xlu0 %925 }
 0x382   : > { %1053 = vrcp.f32 %v926_v4 }
 0x38f   : > { %v1054_v5 = vpop.eup %1053 }
 0x390   : > { %v928_v6 = vmul.f32 %v1054_v5, %v1052_v2 }
 0x392   : > { %929 = vst.msk [vmem:[%s269_s14] sm:$0x1f] %vm917_vm11, %v928_v6 }
 0x393 PF: > { %s16_s21 = sadd.s32 1, %s1061_s21  }
 0x394   : > { %p13_p4 = scmp.ge.s32.totalorder %s16_s21, 4  }
 0x396   :  { %15 = sbr.rel (!%p13_p4) target bundleno = 1 (0x1), region = 77 }

</bundles_post_ra>
